<compile_context>
chip_gen: v7x
topology: tpu7x:2x2x1
jax: 0.10.0
libtpu: 0.0.40
codegen_flags: <defaults>
</compile_context>

<pallas_src>
import jax
import jax.numpy as jnp
from jax.experimental import pallas as pl
from jax.experimental.pallas import tpu as pltpu


def qnet_kernel(x_ref, w1_ref, b1_ref, w2_ref, b2_ref, w3_ref, b3_ref, o_ref):
    # Whole MLP hot path runs out of VMEM: 3 MXU matmuls (bf16 inputs, f32 accumulate)
    # plus VPU bias-add / ReLU in f32.
    x = x_ref[...]                                                       # (bt, obs_pad) bf16
    h = jnp.dot(x, w1_ref[...], preferred_element_type=jnp.float32) + b1_ref[...]
    h = jnp.maximum(h, 0.0)
    h = jnp.dot(h.astype(jnp.bfloat16), w2_ref[...],
                preferred_element_type=jnp.float32) + b2_ref[...]
    h = jnp.maximum(h, 0.0)
    o = jnp.dot(h.astype(jnp.bfloat16), w3_ref[...],
                preferred_element_type=jnp.float32) + b3_ref[...]
    o_ref[...] = o.astype(o_ref.dtype)


def _round_up(x, m):
    return ((x + m - 1) // m) * m


def qnet_forward(x, params, *, batch_tile=512):
    """QNet forward pass.

    x: (B, obs_dim) float32.
    params: dict w1,b1,w2,b2,w3,b3; weights stored (in, out), biases (1, out), float32.
    Returns (B, action_space) float32 Q-values.
    """
    B, obs_dim = x.shape
    n_hidden = params["w1"].shape[1]
    n_act = params["w3"].shape[1]

    # DMA-friendly padding of the observation dim.
    obs_pad = _round_up(obs_dim, 64)

    # Batch tile: capped (amortizes per-step overhead, keeps double buffers small), never
    # larger than the sublane-rounded batch. Pad the batch to a tile multiple (ragged ok).
    bt = max(8, min(batch_tile, _round_up(B, 8)))
    Bp = _round_up(B, bt)

    x_p = jnp.pad(x.astype(jnp.bfloat16), ((0, Bp - B), (0, obs_pad - obs_dim)))
    w1 = jnp.pad(params["w1"].astype(jnp.bfloat16), ((0, obs_pad - obs_dim), (0, 0)))
    w2 = params["w2"].astype(jnp.bfloat16)
    w3 = params["w3"].astype(jnp.bfloat16)
    b1 = params["b1"].astype(jnp.float32)
    b2 = params["b2"].astype(jnp.float32)
    b3 = params["b3"].astype(jnp.float32)

    # Explicit VMEM budget: double-buffered x/out tiles + (grid-constant, DMA'd-once)
    # weights/biases + generous headroom, clamped into [16 MiB, 32 MiB] so it is safe on
    # v5e/v6e (128 MiB physical) and v7x (64 MiB per TensorCore) alike.
    need = (2 * bt * obs_pad * 2                                             # x tiles (bf16)
            + 2 * bt * n_act * 4                                             # out tiles (f32)
            + 2 * 2 * (obs_pad * n_hidden + n_hidden * n_hidden + n_hidden * n_act)  # weights
            + 2 * 4 * (2 * n_hidden + n_act))                                # biases
    vmem_limit = int(min(max(need + (4 << 20), 16 << 20), 32 << 20))

    full = lambda shape: pl.BlockSpec(shape, lambda i: (0, 0))  # grid-constant operand

    out_p = pl.pallas_call(
        qnet_kernel,
        out_shape=jax.ShapeDtypeStruct((Bp, n_act), jnp.float32),
        grid_spec=pltpu.PrefetchScalarGridSpec(
            num_scalar_prefetch=0,
            grid=(Bp // bt,),
            in_specs=[
                pl.BlockSpec((bt, obs_pad), lambda i: (i, 0)),  # x tile
                full((obs_pad, n_hidden)),                      # w1
                full((1, n_hidden)),                            # b1
                full((n_hidden, n_hidden)),                     # w2
                full((1, n_hidden)),                            # b2
                full((n_hidden, n_act)),                        # w3
                full((1, n_act)),                               # b3
            ],
            out_specs=pl.BlockSpec((bt, n_act), lambda i: (i, 0)),
        ),
        compiler_params=pltpu.CompilerParams(
            dimension_semantics=("parallel",),  # batch grid shards across both TCs on v7x
            vmem_limit_bytes=vmem_limit,
        ),
    )(x_p, w1, b1, w2, b2, w3, b3)

    return out_p[:B]


def init_qnet_params(key, obs_dim, n_hidden, n_act):
    """PyTorch nn.Linear default init: U(-1/sqrt(fan_in), 1/sqrt(fan_in))."""
    keys = jax.random.split(key, 6)

    def linear(kw, kb, fan_in, fan_out):
        bound = 1.0 / jnp.sqrt(jnp.float32(fan_in))
        w = jax.random.uniform(kw, (fan_in, fan_out), jnp.float32, -bound, bound)
        b = jax.random.uniform(kb, (1, fan_out), jnp.float32, -bound, bound)
        return w, b

    w1, b1 = linear(keys[0], keys[1], obs_dim, n_hidden)
    w2, b2 = linear(keys[2], keys[3], n_hidden, n_hidden)
    w3, b3 = linear(keys[4], keys[5], n_hidden, n_act)
    return {"w1": w1, "b1": b1, "w2": w2, "b2": b2, "w3": w3, "b3": b3}


def qnet_reference_f32(x, p):
    """Pure-f32 reference (the PyTorch module's math)."""
    h = jnp.maximum(x @ p["w1"] + p["b1"], 0.0)
    h = jnp.maximum(h @ p["w2"] + p["b2"], 0.0)
    return h @ p["w3"] + p["b3"]


def qnet_reference_bf16(x, p):
    """Reference mirroring the kernel's bf16-input / f32-accumulate arithmetic."""
    f32 = lambda a: a.astype(jnp.float32)
    bf = lambda a: a.astype(jnp.bfloat16)
    h = jnp.maximum(f32(bf(x)) @ f32(bf(p["w1"])) + p["b1"], 0.0)
    h = jnp.maximum(f32(bf(h)) @ f32(bf(p["w2"])) + p["b2"], 0.0)
    return f32(bf(h)) @ f32(bf(p["w3"])) + p["b3"]


if __name__ == "__main__":
    # ConnectX: 6x7 board + mark -> obs_dim = 43, action_space = 7 columns.
    obs_dim = 43
    n_hidden = 64
    n_act = 7
    batch = 37        # deliberately ragged: exercises batch padding + a multi-step grid
    batch_tile = 16   # small tile for the demo; production default is 512

    key = jax.random.PRNGKey(0)
    k_params, k_x = jax.random.split(key)
    params = init_qnet_params(k_params, obs_dim, n_hidden, n_act)
    x = jax.random.normal(k_x, (batch, obs_dim), jnp.float32)

    out = qnet_forward(x, params, batch_tile=batch_tile)
    out = jax.block_until_ready(out)
    assert out.shape == (batch, n_act)

    # Tight check vs a reference matching the kernel's mixed bf16/f32 arithmetic.
    ref_bf16 = qnet_reference_bf16(x, params)
    assert jnp.allclose(out, ref_bf16, atol=2e-3, rtol=2e-3), "mismatch vs bf16-matched reference"

    # Looser sanity check vs the pure-f32 PyTorch-equivalent math.
    ref_f32 = qnet_reference_f32(x, params)
    assert jnp.allclose(out, ref_f32, atol=5e-2, rtol=5e-2), "mismatch vs f32 reference"

    # TODO(synk): get_action()'s legal-move masking/argmax is per-board host logic, kept
    # outside the kernel (it is not part of the module's forward()).

    print("KERNEL_OK")
</pallas_src>

<mosaic_0001>
module attributes {stable_mosaic.version = 11 : i64} {
  func.func @qnet_kernel(%arg0: i32, %arg1: memref<16x64xbf16, #tpu.memory_space<vmem>>, %arg2: memref<64x64xbf16, #tpu.memory_space<vmem>>, %arg3: memref<1x64xf32, #tpu.memory_space<vmem>>, %arg4: memref<64x64xbf16, #tpu.memory_space<vmem>>, %arg5: memref<1x64xf32, #tpu.memory_space<vmem>>, %arg6: memref<64x7xbf16, #tpu.memory_space<vmem>>, %arg7: memref<1x7xf32, #tpu.memory_space<vmem>>, %arg8: memref<16x7xf32, #tpu.memory_space<vmem>>) attributes {dimension_semantics = [#tpu.dimension_semantics<parallel>], iteration_bounds = array<i64: 3>, scalar_prefetch = 0 : i64, scratch_operands = 0 : i64, tpu.core_type = #tpu.core_type<tc>, window_params = [{transform_indices = @transform_0, window_bounds = array<i64: 16, 64>}, {pipeline_mode = #tpu.pipeline_mode<synchronous>, transform_indices = @transform_1, window_bounds = array<i64: 64, 64>}, {pipeline_mode = #tpu.pipeline_mode<synchronous>, transform_indices = @transform_2, window_bounds = array<i64: 1, 64>}, {pipeline_mode = #tpu.pipeline_mode<synchronous>, transform_indices = @transform_3, window_bounds = array<i64: 64, 64>}, {pipeline_mode = #tpu.pipeline_mode<synchronous>, transform_indices = @transform_4, window_bounds = array<i64: 1, 64>}, {pipeline_mode = #tpu.pipeline_mode<synchronous>, transform_indices = @transform_5, window_bounds = array<i64: 64, 7>}, {pipeline_mode = #tpu.pipeline_mode<synchronous>, transform_indices = @transform_6, window_bounds = array<i64: 1, 7>}, {transform_indices = @transform_7, window_bounds = array<i64: 16, 7>}]} {
    %c0 = arith.constant 0 : index
    %c0_0 = arith.constant 0 : index
    %0 = vector.load %arg1[%c0, %c0_0] : memref<16x64xbf16, #tpu.memory_space<vmem>>, vector<16x64xbf16>
    %c0_1 = arith.constant 0 : index
    %c0_2 = arith.constant 0 : index
    %1 = vector.load %arg2[%c0_1, %c0_2] : memref<64x64xbf16, #tpu.memory_space<vmem>>, vector<64x64xbf16>
    %cst = arith.constant dense<0.000000e+00> : vector<16x64xf32>
    %2 = tpu.matmul %0, %1, %cst {dimension_numbers = #tpu.dot_dimension_numbers<[1], [0], [0], [1], [0, 0, 1, 1], [], []>} : vector<16x64xbf16>, vector<64x64xbf16>, vector<16x64xf32> -> vector<16x64xf32>
    %c0_3 = arith.constant 0 : index
    %c0_4 = arith.constant 0 : index
    %3 = vector.load %arg3[%c0_3, %c0_4] : memref<1x64xf32, #tpu.memory_space<vmem>>, vector<1x64xf32>
    %4 = vector.broadcast %3 : vector<1x64xf32> to vector<16x64xf32>
    %5 = arith.addf %2, %4 : vector<16x64xf32>
    %cst_5 = arith.constant 0.000000e+00 : f32
    %6 = vector.broadcast %cst_5 : f32 to vector<16x64xf32>
    %7 = arith.maximumf %5, %6 : vector<16x64xf32>
    %8 = arith.truncf %7 : vector<16x64xf32> to vector<16x64xbf16>
    %c0_6 = arith.constant 0 : index
    %c0_7 = arith.constant 0 : index
    %9 = vector.load %arg4[%c0_6, %c0_7] : memref<64x64xbf16, #tpu.memory_space<vmem>>, vector<64x64xbf16>
    %cst_8 = arith.constant dense<0.000000e+00> : vector<16x64xf32>
    %10 = tpu.matmul %8, %9, %cst_8 {dimension_numbers = #tpu.dot_dimension_numbers<[1], [0], [0], [1], [0, 0, 1, 1], [], []>} : vector<16x64xbf16>, vector<64x64xbf16>, vector<16x64xf32> -> vector<16x64xf32>
    %c0_9 = arith.constant 0 : index
    %c0_10 = arith.constant 0 : index
    %11 = vector.load %arg5[%c0_9, %c0_10] : memref<1x64xf32, #tpu.memory_space<vmem>>, vector<1x64xf32>
    %12 = vector.broadcast %11 : vector<1x64xf32> to vector<16x64xf32>
    %13 = arith.addf %10, %12 : vector<16x64xf32>
    %cst_11 = arith.constant 0.000000e+00 : f32
    %14 = vector.broadcast %cst_11 : f32 to vector<16x64xf32>
    %15 = arith.maximumf %13, %14 : vector<16x64xf32>
    %16 = arith.truncf %15 : vector<16x64xf32> to vector<16x64xbf16>
    %c0_12 = arith.constant 0 : index
    %c0_13 = arith.constant 0 : index
    %17 = vector.load %arg6[%c0_12, %c0_13] : memref<64x7xbf16, #tpu.memory_space<vmem>>, vector<64x7xbf16>
    %cst_14 = arith.constant dense<0.000000e+00> : vector<16x7xf32>
    %18 = tpu.matmul %16, %17, %cst_14 {dimension_numbers = #tpu.dot_dimension_numbers<[1], [0], [0], [1], [0, 0, 1, 1], [], []>} : vector<16x64xbf16>, vector<64x7xbf16>, vector<16x7xf32> -> vector<16x7xf32>
    %c0_15 = arith.constant 0 : index
    %c0_16 = arith.constant 0 : index
    %19 = vector.load %arg7[%c0_15, %c0_16] : memref<1x7xf32, #tpu.memory_space<vmem>>, vector<1x7xf32>
    %20 = vector.broadcast %19 : vector<1x7xf32> to vector<16x7xf32>
    %21 = arith.addf %18, %20 : vector<16x7xf32>
    %c0_17 = arith.constant 0 : index
    %c0_18 = arith.constant 0 : index
    %22 = vector.load %arg8[%c0_17, %c0_18] : memref<16x7xf32, #tpu.memory_space<vmem>>, vector<16x7xf32>
    tpu.vector_store %arg8[%c0_17, %c0_18], %21 {strides = array<i32>} : memref<16x7xf32, #tpu.memory_space<vmem>>, vector<16x7xf32>,
    return
  }
  func.func @transform_0(%arg0: i32) -> (i32, i32) {
    %c0_i32 = arith.constant 0 : i32
    %c0_i32_0 = arith.constant 0 : i32
    return %arg0, %c0_i32 : i32, i32
  }
  func.func @transform_1(%arg0: i32) -> (i32, i32) {
    %c0_i32 = arith.constant 0 : i32
    %c0_i32_0 = arith.constant 0 : i32
    %c0_i32_1 = arith.constant 0 : i32
    return %c0_i32, %c0_i32_0 : i32, i32
  }
  func.func @transform_2(%arg0: i32) -> (i32, i32) {
    %c0_i32 = arith.constant 0 : i32
    %c0_i32_0 = arith.constant 0 : i32
    %c0_i32_1 = arith.constant 0 : i32
    return %c0_i32, %c0_i32_0 : i32, i32
  }
  func.func @transform_3(%arg0: i32) -> (i32, i32) {
    %c0_i32 = arith.constant 0 : i32
    %c0_i32_0 = arith.constant 0 : i32
    %c0_i32_1 = arith.constant 0 : i32
    return %c0_i32, %c0_i32_0 : i32, i32
  }
  func.func @transform_4(%arg0: i32) -> (i32, i32) {
    %c0_i32 = arith.constant 0 : i32
    %c0_i32_0 = arith.constant 0 : i32
    %c0_i32_1 = arith.constant 0 : i32
    return %c0_i32, %c0_i32_0 : i32, i32
  }
  func.func @transform_5(%arg0: i32) -> (i32, i32) {
    %c0_i32 = arith.constant 0 : i32
    %c0_i32_0 = arith.constant 0 : i32
    %c0_i32_1 = arith.constant 0 : i32
    return %c0_i32, %c0_i32_0 : i32, i32
  }
  func.func @transform_6(%arg0: i32) -> (i32, i32) {
    %c0_i32 = arith.constant 0 : i32
    %c0_i32_0 = arith.constant 0 : i32
    %c0_i32_1 = arith.constant 0 : i32
    return %c0_i32, %c0_i32_0 : i32, i32
  }
  func.func @transform_7(%arg0: i32) -> (i32, i32) {
    %c0_i32 = arith.constant 0 : i32
    %c0_i32_0 = arith.constant 0 : i32
    return %arg0, %c0_i32 : i32, i32
  }
}

</mosaic_0001>

<bundles_post_ra>
// kernel: tpu_custom_call.1
= control target key start
LH: loop header
LB: loop body
LE: loop exit
PB: predicated region body
PF: predicated region fallthrough
CT: control target
= control target key end

     0   :  { %12 = vsyncpa [#allocation3], 0  ;;  %s1150_s0 = inlined_call_operand.hbm [shape: bf16[48,64], index: 0, kind: input, shape index: {}]   ;;  %s1151_s1 = inlined_call_operand.vmem [shape: bf16[64,64], index: 1, kind: input, shape index: {}]   ;;  %s1152_s2 = inlined_call_operand.vmem [shape: f32[1,64], index: 2, kind: input, shape index: {}]   ;;  %s1153_s3 = inlined_call_operand.hbm [shape: bf16[64,64], index: 3, kind: input, shape index: {}]   ;;  %s1154_s4 = inlined_call_operand.vmem [shape: f32[1,64], index: 4, kind: input, shape index: {}]   ;;  %s1155_s5 = inlined_call_operand.vmem [shape: bf16[64,7], index: 5, kind: input, shape index: {}]   ;;  %s1156_s6 = inlined_call_operand.vmem [shape: f32[1,7], index: 6, kind: input, shape index: {}]   ;;  %s1157_s7 = inlined_call_operand.vmem [shape: f32[48,7], index: 7, kind: output, shape index: {}]  }
   0x1   :  { %14 = vsyncpa [#allocation3 + $0x1], 0 }
   0x2   :  { %15 = vsyncpa [#allocation5], 0  ;;  %s957_s24 = smov 0   ;;  %s959_s25 = smov 0  }
   0x3   :  { %s961_s26 = smov 0   ;;  %s963_s27 = smov 0  }
   0x4 LB: > { %s660_s28 = sadd.s32 4294967295, %s909_s27   ;;  %p41_p0 = scmp.ne.s32.totalorder %s901_s25, %s897_s24  ;;  %s909_s27 = sphi %s963_s27, %s1173_s27   ;;  %s905_s26 = sphi %s961_s26, %s1172_s26   ;;  %s901_s25 = sphi %s959_s25, %s1171_s25   ;;  %s897_s24 = sphi %s957_s24, %s1170_s24  }
   0x5   : > { %p979_p1 = scmp.eq.s32.totalorder %s660_s28, 0  ;;  %p662_p2 = scmp.ge.s32.totalorder %s909_s27, 1 }
   0x6   : > { %p204_p3 = scmp.lt.s32.totalorder %s909_s27, 4  ;;  %s911_s9 = smov [#allocation4]  }
   0x7   : > { %s1162_s29 = scalar_select %p979_p1, 1, 0 }
   0x8   : > { %p987_p4 = por %p979_p1, %p41_p0  ;;  %p991_p5 = pnand %p662_p2, %p204_p3 }
   0x9   : > { %s222_s10 = sshll.u32 %s911_s9, 4  ;;  %s1004_s12 = sadd.s32 1, %s909_s27   ;;  %s223_s10 = int_to_ptr.vmem [resolvable:$true] %s222_s10 }
   0xa   : > { %s1163_s30 = scalar_select %p987_p4, 1, 0 }
   0xb   : > { %s1164_s8 = scalar_select %p991_p5, 1, 0 }
   0xc   : > { %p752_p6 = pneg %p991_p5  ;;  %s28_s13 = sadd.s32 1, %s905_s26 }
   0xd   : > { %s25_s14 = ssub.s32 %s909_s27, %s1004_s12  ;;  %s813_s17 = scalar_lea.hbm %s1153_s3, 512 }
   0xe   : > { %p999_p7 = pnand %p752_p6, %p979_p1  ;;  %p814_p8 = scmp.ne.s32.totalorder %s1153_s3, %s813_s17 }
   0xf   : > { %p820_p12 = scmp.lt.u32.totalorder %s813_s17, %s1153_s3 }
  0x10   : > { %p815_p9 = pneg %p999_p7 }
  0x12   : > { %p816_p10 = pnand %p815_p9, %p814_p8 }
  0x14   : > { %p817_p11 = pneg %p816_p10 }
  0x16   : > { %p822_p13 = pnand %p820_p12, %p817_p11 }
  0x18   : > { %825 = shalt.err (!%p822_p13)
}
  0x19   : > { %s826_s22 = scalar_lea.vmem %s223_s10, 512  ;;  %p834_p6 = scmp.lt.s32.totalorder %s223_s10, %s223_s10 }
  0x1a   : > { %p827_p0 = scmp.ne.s32.totalorder %s223_s10, %s826_s22  ;;  %p835_p1 = scmp.lt.s32.totalorder %s826_s22, %s826_s22 }
  0x1c   : > { %p829_p2 = pnand %p827_p0, %p815_p9  ;;  %p836_p4 = por %p835_p1, %p834_p6 }
  0x1e   : > { %p830_p3 = pneg %p829_p2 }
  0x20   : > { %p837_p5 = pnand %p836_p4, %p830_p3 }
  0x22   : > { %840 = shalt.err (!%p837_p5)
}
  0x23   : > { %s912_s23 = smov 64   ;;  %s913_s24 = smov 4  }
  0x24   : > { %755 = dma.hbm_to_vmem [thread:$0]  (!%p999_p7), %s1153_s3, 512, %s223_s10, [#allocation5], %s912_s23, %s912_s23, %s913_s24  }
  0x25   : > { %p26_p1 = scmp.eq.s32.totalorder %s25_s14, 0  ;;  %p35_p4 = scmp.ne.s32.totalorder %s905_s26, %s901_s25 }
  0x26   : > { %p36_p5 = scmp.eq.s32.totalorder %s909_s27, 0  ;;  %p761_p8 = scmp.lt.s32.totalorder %s909_s27, 3 }
  0x27   : > { %s1033_s16 = scalar_select %p26_p1, %s905_s26, %s28_s13  }
  0x28   : > { %p37_p9 = por %p36_p5, %p35_p4  ;;  %s245_s17 = sand.u32 1, %s905_s26  }
  0x29   : > { %s665_s18 = sshll.u32 %s245_s17, 3  ;;  %s694_s19 = sshll.u32 %s909_s27, 7 }
  0x2a   : > { %s1040_s11 = scalar_lea.hbm %s1150_s0, %s694_s19  ;;  %s249_s10 = scalar_lea.vmem [#allocation2], %s665_s18 }
  0x2b   : > { %s256_s14 = sshll.u32 %s249_s10, 4  ;;  %p1044_p7 = pnand %p761_p8, %p37_p9  ;;  %s1042_s14 = int_to_ptr.vmem [resolvable:$true] %s256_s14 }
  0x2c   : > { %s1048_s22 = scalar_lea.sflag [#allocation3], %s245_s17  ;;  %s841_s9 = scalar_lea.hbm %s1040_s11, 128 }
  0x2d   : > { %p842_p10 = scmp.ne.s32.totalorder %s1040_s11, %s841_s9  ;;  %p843_p11 = pneg %p1044_p7 }
  0x2e   : > { %s846_s19 = scalar_lea.hbm %s1150_s0, 384  ;;  %p847_p0 = scmp.lt.u32.totalorder %s1040_s11, %s1150_s0 }
  0x2f   : > { %p844_p12 = pnand %p843_p11, %p842_p10  ;;  %p848_p2 = scmp.lt.u32.totalorder %s846_s19, %s841_s9 }
  0x30   : > { %p850_p6 = scmp.lt.u32.totalorder %s841_s9, %s1040_s11 }
  0x31   : > { %p845_p13 = pneg %p844_p12  ;;  %p849_p3 = por %p848_p2, %p847_p0 }
  0x33   : > { %p851_p1 = por %p850_p6, %p849_p3 }
  0x35   : > { %p852_p4 = pnand %p851_p1, %p845_p13 }
  0x37   : > { %855 = shalt.err (!%p852_p4)
}
  0x38   : > { %s856_s17 = scalar_lea.vmem %s1042_s14, 128  ;;  %s914_s10 = smov [#allocation2]  }
  0x39   : > { %p857_p5 = scmp.ne.s32.totalorder %s1042_s14, %s856_s17  ;;  %s861_s15 = sshll.u32 %s914_s10, 4  ;;  %s862_s15 = int_to_ptr.vmem [resolvable:$false] %s861_s15 }
  0x3a   : > { %s863_s18 = scalar_lea.vmem %s862_s15, 256  ;;  %p864_p10 = scmp.lt.s32.totalorder %s1042_s14, %s862_s15 }
  0x3b   : > { %p859_p8 = pnand %p857_p5, %p843_p11  ;;  %p865_p12 = scmp.lt.s32.totalorder %s863_s18, %s856_s17 }
  0x3d   : > { %p860_p9 = pneg %p859_p8  ;;  %p866_p0 = por %p865_p12, %p864_p10 }
  0x3f   : > { %p867_p2 = pnand %p866_p0, %p860_p9 }
  0x41   : > { %870 = shalt.err (!%p867_p2)
}
  0x42   : > { %759 = dma.hbm_to_vmem [thread:$0]  (!%p1044_p7), %s1040_s11, 128, %s1042_s14, %s1048_s22, %s912_s23, %s912_s23, %s913_s24  }
  0x43   : > { %p1167_p11 = scmp.ne.s32.totalorder %s1164_s8, 0 }
  0x44   : > { %s270_s9 = sand.u32 (!%p1167_p11), 1, %s901_s25   ;;  %p1168_p13 = scmp.ne.s32.totalorder (!%p1167_p11), %s1163_s30, 0 }
  0x45   : > { %268 = sbr.rel (%p1167_p11) target bundleno = 755 (0x2f3), region = 48  ;;  %s1082_s19 = sshll.u32 (!%p1167_p11), %s270_s9, 3 }
  0x46   : > { %s271_s20 = scalar_lea.sflag (!%p1167_p11), [#allocation3], %s270_s9  ;;  %s274_s21 = scalar_lea.vmem (!%p1167_p11), [#allocation2], %s1082_s19 }
  0x4c   : > { %888 = dma.done.wait (%p1168_p13), %s271_s20, 128  }
  0x4d   : > { %890 = vsyncadd (%p1168_p13), %s271_s20, 4294967168  ;;  %p1169_p3 = scmp.ne.s32.totalorder %s1162_s29, 0 }
  0x4f   : > { %892 = dma.done.wait (%p1169_p3), [#allocation5], 512  }
  0x50   : > { %894 = vsyncadd (%p1169_p3), [#allocation5], 4294966784  ;;  %v915_v0 = vmov 0.0   ;;  %vm916_vm0 = vmmov 0   ;;  %v800_v1 = vld [vmem:[%s1151_s1] sm:$0xff]   ;;  %v801_v2 = vld [vmem:[%s1151_s1 + $0x8] sm:$0xff]  }
  0x51   : > { %710 = vmatprep.subr.bf16.mxu0 %v915_v0  ;;  %718 = vmatprep.mubr.msk.bf16.mxu0 %vm916_vm0, %v915_v0  ;;  %v805_v3 = vld [vmem:[#allocation4] sm:$0xff]   ;;  %v806_v5 = vld [vmem:[#allocation4 + $0x8] sm:$0xff]   ;;  %v804_v7 = vld [vmem:[%s274_s21] sm:$0xff]   ;;  %vm363_vm1 = vcmask 523264   ;;  %s671_s24 = sshll.u32 %s660_s28, 1  ;;  %vm580_vm2 = vcmask 56320  }
  0x52   : > { %722 = vmatprep.subr.bf16.mxu1 %v915_v0  ;;  %730 = vmatprep.mubr.msk.bf16.mxu1 %vm916_vm0, %v915_v0  ;;  %v802_v4 = vld [vmem:[%s1151_s1 + $0x10] sm:$0xff]   ;;  %v803_v6 = vld [vmem:[%s1151_s1 + $0x18] sm:$0xff]   ;;  %v807_v8 = vld [vmem:[#allocation4 + $0x10] sm:$0xff]   ;;  %p311_p7 = scmp.lt.s32.totalorder %s671_s24, 5 }
  0x53   : > { %711 = vmatpush3.bf16.msra.mxu0 %v800_v1  ;;  %723 = vmatpush3.bf16.msra.mxu1 %v805_v3  ;;  %v808_v9 = vld [vmem:[#allocation4 + $0x18] sm:$0xff]   ;;  %v809_v10 = vld [vmem:[%s1155_s5] sm:$0xff]   ;;  %v811_v22 = vld [vmem:[%s1155_s5 + $0x10] sm:$0xff]  }
  0x54   : > { %712 = vmatprep.subr.bf16.mxu0 %v915_v0  ;;  %724 = vmatprep.subr.bf16.mxu1 %v915_v0  ;;  %v810_v11 = vld [vmem:[%s1155_s5 + $0x8] sm:$0xff]   ;;  %v673_v12 = vld [vmem:[%s1152_s2] ss:$0 sm:$0xff]  ;;  %v812_v23 = vld [vmem:[%s1155_s5 + $0x18] sm:$0xff]   ;;  %s1175_s24 = smov (!%p311_p7, %s671_s24), 5 }
  0x55   : > { %v680_v24 = vld [vmem:[%s1154_s4] ss:$0 sm:$0xff]  ;;  %s672_s29 = sshll.u32 %s1175_s24, 3 }
  0x56   : > { %v686_v34 = vld [vmem:[%s1156_s6] ss:$0 sm:$0xff]  ;;  %s314_s17 = scalar_lea.vmem %s1157_s7, %s672_s29 }
  0x57   : > { %713 = vmatpush3.bf16.msra.mxu0 %v801_v2  ;;  %725 = vmatpush3.bf16.msra.mxu1 %v806_v5 }
  0x58   : > { %714 = vmatprep.subr.bf16.mxu0 %v915_v0  ;;  %726 = vmatprep.subr.bf16.mxu1 %v915_v0 }
  0x5b   : > { %715 = vmatpush3.bf16.msra.mxu0 %v802_v4  ;;  %727 = vmatpush3.bf16.msra.mxu1 %v807_v8 }
  0x5c   : > { %716 = vmatprep.subr.bf16.mxu0 %v915_v0  ;;  %728 = vmatprep.subr.bf16.mxu1 %v915_v0 }
  0x5f   : > { %717 = vmatpush3.bf16.msra.mxu0 %v803_v6  ;;  %729 = vmatpush3.bf16.msra.mxu1 %v808_v9 }
  0x60   : > { %734 = vmatprep.subr.bf16.mxu0 %v915_v0 }
  0x62   : > { %719 = vmatmul.mubr.msk.bf16.vlgmr.msra.gmra.mrb[0].mxu0 %vm363_vm1, %v804_v7 }
  0x63   : > { %742 = vmatprep.mubr.msk.bf16.mxu0 %vm916_vm0, %v915_v0  ;;  %735 = vmatpush3.bf16.msra.mxu0 %v809_v10 }
  0x64   : > { %736 = vmatprep.subr.bf16.mxu0 %v915_v0 }
  0x67   : > { %737 = vmatpush3.bf16.msra.mxu0 %v810_v11 }
  0x68   : > { %738 = vmatprep.subr.bf16.mxu0 %v915_v0 }
  0x6b   : > { %739 = vmatpush3.bf16.msra.mxu0 %v811_v22 }
  0x6c   : > { %740 = vmatprep.subr.bf16.mxu0 %v915_v0 }
  0x6f   : > { %741 = vmatpush3.bf16.msra.mxu0 %v812_v23 }
 0x135   : > { %v401_v13 = vpop.f32.mrb[0].mxu0 }
 0x136   : > { %v402_v14 = vadd.f32 %v673_v12, %v401_v13  ;;  %v720_v15 = vpop.f32.mrb[1].mxu0 }
 0x137   : > { %v404_v16 = vpop.f32.mrb[2].mxu0 }
 0x138   : > { %v405_v17 = vadd.f32 %v673_v12, %v404_v16  ;;  %v721_v18 = vpop.f32.mrb[3].mxu0  ;;  %v408_v19 = vmax.f32 %v402_v14, 0.0 }
 0x13a   : > { %v409_v20 = vmax.f32 %v405_v17, 0.0 }
 0x13c   : > { %v410_v21 = vpack.c.bf16 %v409_v20, %v408_v19 }
 0x13e   : > { %731 = vmatmul.mubr.msk.bf16.vlgmr.msra.gmra.mrb[0].mxu1 %vm363_vm1, %v410_v21 }
 0x211   : > { %v487_v25 = vpop.f32.mrb[0].mxu1 }
 0x212   : > { %v488_v26 = vadd.f32 %v680_v24, %v487_v25  ;;  %v732_v27 = vpop.f32.mrb[1].mxu1 }
 0x213   : > { %v490_v28 = vpop.f32.mrb[2].mxu1 }
 0x214   : > { %v491_v29 = vadd.f32 %v680_v24, %v490_v28  ;;  %v733_v30 = vpop.f32.mrb[3].mxu1  ;;  %v494_v31 = vmax.f32 %v488_v26, 0.0 }
 0x216   : > { %v495_v32 = vmax.f32 %v491_v29, 0.0 }
 0x218   : > { %v496_v33 = vpack.c.bf16 %v495_v32, %v494_v31 }
 0x21a   : > { %743 = vmatmul.mubr.msk.bf16.vlgmr.msra.gmra.mrb[4].mxu0 %vm363_vm1, %v496_v33 }
 0x2ed   : > { %v573_v35 = vpop.f32.mrb[4].mxu0 }
 0x2ee   : > { %v574_v36 = vadd.f32 %v686_v34, %v573_v35  ;;  %v744_v37 = vpop.f32.mrb[5].mxu0 }
 0x2ef   : > { %v576_v38 = vpop.f32.mrb[6].mxu0 }
 0x2f0   : > { %581 = vst.msk [vmem:[%s314_s17] sm:$0xff] %vm580_vm2, %v574_v36  ;;  %v577_v39 = vadd.f32 %v686_v34, %v576_v38  ;;  %v745_v40 = vpop.f32.mrb[7].mxu0 }
 0x2f2   : > { %582 = vst.msk [vmem:[%s314_s17 + $0x8] sm:$0xff] %vm580_vm2, %v577_v39 }
 0x2f3 PF: > { %p18_p6 = scmp.ge.s32.totalorder %s1004_s12, 5   ;;  %s1170_s24 = smov %s901_s25 }
 0x2f4   : > { %s1171_s25 = smov %s905_s26  ;;  %s1172_s26 = smov %s1033_s16 }
 0x2f5   : > { %s1173_s27 = smov %s1004_s12  ;;  %20 = sbr.rel (!%p18_p6) target bundleno = 4 (0x4), region = 92 }
 0x2fc   :  { %605 = vsyncpa [#allocation3], 1 }
 0x2fd   :  { %607 = vsyncpa [#allocation3 + $0x1], 1 }
 0x2fe   :  { %608 = vsyncpa [#allocation5], 1 }

</bundles_post_ra>
